<compile_context>
chip_gen: v6e
topology: v6e:2x2x1
jax: 0.10.0
libtpu: 0.0.40
codegen_flags: <defaults>
</compile_context>

<pallas_src>
import functools
import math

import jax
import jax.numpy as jnp
from jax.experimental import pallas as pl
from jax.experimental.pallas import tpu as pltpu


# --------------------------------------------------------------------------
# Host-side operator construction (plain-JAX glue)
# --------------------------------------------------------------------------
def _centered_dft_mats(n, inverse=False):
    """A = P_fftshift @ F_ortho @ P_ifftshift, returned as (real, imag) f32 (n, n)."""
    eye = jnp.eye(n, dtype=jnp.complex64)
    shifted = jnp.fft.ifftshift(eye, axes=0)
    f = (jnp.fft.ifft if inverse else jnp.fft.fft)(shifted, axis=0, norm="ortho")
    a = jnp.fft.fftshift(f, axes=0)
    return jnp.real(a).astype(jnp.float32), jnp.imag(a).astype(jnp.float32)


def _embed(m, n):
    """Zero-pad a (w, w) operator into the top-left of an (n, n) block (exact)."""
    if m.shape[0] == n:
        return m
    return jnp.zeros((n, n), m.dtype).at[: m.shape[0], : m.shape[1]].set(m)


def _block_diag(m, reps):
    if reps == 1:
        return m
    return jnp.kron(jnp.eye(reps, dtype=m.dtype), m)


# --------------------------------------------------------------------------
# Kernel
# --------------------------------------------------------------------------
def _dc_kernel(alpha, h, wop, chunks,
               x_ref, k0_ref, m_ref,
               ah_ref, wf_ref, bh1_ref, bh2_ref, wb_ref,
               out_ref):
    """One grid step = `chunks` independent wop-lane column groups."""
    ah = ah_ref[...]      # (2H, H)      [Ahr; Ahi]
    wf = wf_ref[...]      # (wop, 2wop)  [Dfr | Dfi]   (block-diag Aw^T)
    bh1 = bh1_ref[...]    # (2H, H)      [Bhr; Bhi]
    bh2 = bh2_ref[...]    # (2H, H)      [-Bhi; Bhr]
    wb = wb_ref[...]      # (wop, 2wop)  [Dbr | Dbi]   (block-diag Bw^T)
    f32, bf16 = jnp.float32, jnp.bfloat16

    for j in range(chunks):               # static: reuses the fixed-size operators
        cols = pl.ds(j * wop, wop)
        # (1) forward H-axis DFT:  [Cr; Ci] = [Ahr; Ahi] @ X            (2H, wop)
        c = jnp.dot(ah, x_ref[:, cols], preferred_element_type=f32)
        # (2) forward W-axis DFT ("p-trick", no concatenate):
        #     P = [Cr; Ci] @ [Dr | Di]                                   (2H, 2wop)
        p = jnp.dot(c.astype(bf16), wf, preferred_element_type=f32)
        kr = p[:h, :wop] - p[h:, wop:]        # Cr@Dr - Ci@Di
        ki = p[:h, wop:] + p[h:, :wop]        # Cr@Di + Ci@Dr
        # (3) k-space data consistency in f32:  k + alpha*m*(k0 - k)
        m = m_ref[:, cols].astype(f32)
        if alpha != 1.0:                      # alpha is a static Python float
            m = alpha * m
        krc = kr + m * (k0_ref[pl.ds(0, h), cols].astype(f32) - kr)
        kic = ki + m * (k0_ref[pl.ds(h, h), cols].astype(f32) - ki)
        # (4) inverse H-axis DFT, split into two (2H,H) matmuls so [Er; Ei]
        #     lands directly in the sublane-stacked layout step (5) needs
        #     (no scratch write / concatenate):
        #     [Er; Ei] = [Bhr; Bhi] @ Krc + [-Bhi; Bhr] @ Kic            (2H, wop)
        e = (jnp.dot(bh1, krc.astype(bf16), preferred_element_type=f32)
             + jnp.dot(bh2, kic.astype(bf16), preferred_element_type=f32))
        # (5) inverse W-axis DFT ("p-trick") + magnitude:
        q = jnp.dot(e.astype(bf16), wb, preferred_element_type=f32)
        gr = q[:h, :wop] - q[h:, wop:]
        gi = q[:h, wop:] + q[h:, :wop]
        out_ref[:, cols] = jnp.sqrt(gr * gr + gi * gi)   # lane-dense (wop-wide) store


# --------------------------------------------------------------------------
# Wrapper (module-compatible interface)
# --------------------------------------------------------------------------
def data_consistency_in_kspace(x, k0, mask, noise_lvl=None):
    """x, k0, mask: (1, 1, H, W, T); x/mask real, k0 complex. Returns (1,1,H,W,T) f32."""
    batch, n_ch, height, width, seq = x.shape
    if batch != 1 or n_ch != 1:
        raise NotImplementedError("Only implemented batchsize 1 and n_ch 1")
    cdiv = lambda a, b: -(-a // b)

    # ---- frame / block geometry (static Python) ------------------------------
    # Minimal lane-dense frame packing: wop = lcm(W,128) lanes per operator
    # block (tb_op frames).  If lcm(W,128) would be large, zero-pad each frame
    # to the next multiple of 128 lanes instead (exact).
    # TODO(synk): very large W (operator > a few MiB) would need a K-tiled
    #             W-side matmul instead of a single resident operator.
    if math.lcm(width, 128) <= 1024:
        wpad = width
    else:
        wpad = cdiv(width, 128) * 128
    tb_op = math.lcm(wpad, 128) // wpad          # frames per operator block
    wop = tb_op * wpad                           # lanes per chunk (multiple of 128)

    total_chunks = cdiv(seq, tb_op)
    # Per-step block: grow towards ~512 lanes (amortizes ~0.35us/step), stay
    # under ~16 MiB of (double-buffered) per-step data, and keep >= 2 grid
    # steps when possible so ("parallel",) can shard across both v7x cores.
    bytes_per_chunk = height * wop * (2 + 2 * 2 + 2 + 4)   # x, k0(2H), m bf16 + out f32
    max_chunks_vmem = max(1, (16 << 20) // bytes_per_chunk)
    desired_chunks = max(1, 512 // wop)
    chunks = max(1, min(desired_chunks, total_chunks, max_chunks_vmem))
    if total_chunks >= 2:
        chunks = min(chunks, cdiv(total_chunks, 2))
    nblk = cdiv(total_chunks, chunks)
    seq_pad = nblk * chunks * tb_op
    block_w = chunks * wop

    # ---- pack (1,1,H,W,T) -> (H, seq_pad*wpad) bf16 slabs ---------------------
    # (These transposes/pads are interface glue forced by the module's layout;
    #  a slab-native caller could hand the kernel this layout directly.
    #  x is treated as real, matching the module's real image input.)
    def to_slab(a):
        a = jnp.transpose(a, (0, 2, 1))                      # (H, T, W)
        a = jnp.pad(a, ((0, 0), (0, seq_pad - seq), (0, wpad - width)))
        return a.reshape(height, seq_pad * wpad).astype(jnp.bfloat16)

    xs = to_slab(jnp.real(x[0, 0]))
    ms = to_slab(jnp.real(mask[0, 0]))
    k0s = jnp.concatenate([to_slab(jnp.real(k0[0, 0])),
                           to_slab(jnp.imag(k0[0, 0]))], axis=0)  # (2H, .) Re/Im sublane-stacked

    # ---- constant centered-DFT operators (bf16 MXU operands) ------------------
    ahr, ahi = _centered_dft_mats(height, inverse=False)
    bhr, bhi = _centered_dft_mats(height, inverse=True)
    awr, awi = _centered_dft_mats(width, inverse=False)
    bwr, bwi = _centered_dft_mats(width, inverse=True)

    ah = jnp.concatenate([ahr, ahi], axis=0).astype(jnp.bfloat16)     # (2H, H)
    bh1 = jnp.concatenate([bhr, bhi], axis=0).astype(jnp.bfloat16)    # (2H, H)
    bh2 = jnp.concatenate([-bhi, bhr], axis=0).astype(jnp.bfloat16)   # (2H, H)
    wf = jnp.concatenate([_block_diag(_embed(awr.T, wpad), tb_op),
                          _block_diag(_embed(awi.T, wpad), tb_op)],
                         axis=1).astype(jnp.bfloat16)                 # (wop, 2wop)
    wb = jnp.concatenate([_block_diag(_embed(bwr.T, wpad), tb_op),
                          _block_diag(_embed(bwi.T, wpad), tb_op)],
                         axis=1).astype(jnp.bfloat16)                 # (wop, 2wop)

    alpha = float(noise_lvl) / (1.0 + float(noise_lvl)) if noise_lvl else 1.0

    def build_call(single_buffer_ops):
        data_spec = lambda rows: pl.BlockSpec((rows, block_w), lambda i: (0, i))
        if single_buffer_ops:
            # Constant index_map => fetched once; one VMEM buffer is enough.
            op_spec = lambda shape: pl.BlockSpec(shape, lambda i: (0, 0),
                                                 pipeline_mode=pl.Buffered(1))
        else:
            op_spec = lambda shape: pl.BlockSpec(shape, lambda i: (0, 0))
        return pl.pallas_call(
            functools.partial(_dc_kernel, alpha, height, wop, chunks),
            out_shape=jax.ShapeDtypeStruct((height, seq_pad * wpad), jnp.float32),
            grid=(nblk,),
            in_specs=[data_spec(height),             # x slab
                      data_spec(2 * height),         # k0 slab (Re/Im stacked)
                      data_spec(height),             # mask slab
                      op_spec((2 * height, height)),     # ah
                      op_spec((wop, 2 * wop)),           # wf
                      op_spec((2 * height, height)),     # bh1
                      op_spec((2 * height, height)),     # bh2
                      op_spec((wop, 2 * wop))],          # wb
            out_specs=data_spec(height),
            compiler_params=pltpu.CompilerParams(
                dimension_semantics=("parallel",),
                vmem_limit_bytes=48 * 1024 * 1024),      # headroom under v7x's 64 MiB
        )

    args = (xs, k0s, ms, ah, wf, bh1, bh2, wb)
    try:
        out = build_call(True)(*args)
    except Exception:
        # Single-buffering the constant operators is a pure VMEM optimization;
        # fall back to default double buffering if this jax/Mosaic build
        # rejects pipeline_mode=pl.Buffered(1).
        out = build_call(False)(*args)

    # (H, seq_pad*wpad) -> (1, 1, H, W, T)
    out = out.reshape(height, seq_pad, wpad)[:, :seq, :width]
    return jnp.transpose(out, (0, 2, 1))[None, None]


# --------------------------------------------------------------------------
# Pure-JAX reference (mirror of the PyTorch forward) and self-test
# --------------------------------------------------------------------------
def _reference(x, k0, mask, noise_lvl=None):
    xf = jnp.transpose(x[0, 0], (2, 0, 1))
    k0f = jnp.transpose(k0[0, 0], (2, 0, 1))
    mf = jnp.transpose(mask[0, 0], (2, 0, 1))
    ax = (-2, -1)
    k = jnp.fft.fftshift(
        jnp.fft.fft2(jnp.fft.ifftshift(xf, axes=ax), norm="ortho"), axes=ax)
    if noise_lvl:
        kc = (1 - mf) * k + mf * (k + noise_lvl * k0f) / (1 + noise_lvl)
    else:
        kc = (1 - mf) * k + mf * k0f
    xr = jnp.abs(jnp.fft.fftshift(
        jnp.fft.ifft2(jnp.fft.ifftshift(kc, axes=ax), norm="ortho"), axes=ax))
    return jnp.transpose(xr, (1, 2, 0))[None, None].astype(jnp.float32)


if __name__ == "__main__":
    configs = [
        # (H, W, T, noise_lvl)
        (16, 16, 8, None),    # single 128-lane block
        (16, 16, 24, 0.5),    # multi-chunk blocks, 2-step grid, seq padding
        (16, 24, 8, None),    # 128 % W != 0 -> lcm frame packing (wop = 384)
        (16, 100, 8, 0.5),    # lcm too large -> frames zero-padded to 128 lanes
    ]
    key = jax.random.PRNGKey(0)
    for (H, W, T, nl) in configs:
        key, kx, kk, km = jax.random.split(key, 4)
        x = jax.random.normal(kx, (1, 1, H, W, T), dtype=jnp.float32)
        # k0: centered k-space of a reference image (complex64).
        ref_img = jax.random.normal(kk, (1, 1, H, W, T), dtype=jnp.float32)
        ref_frames = jnp.transpose(ref_img[0, 0], (2, 0, 1))
        k0_frames = jnp.fft.fftshift(
            jnp.fft.fft2(jnp.fft.ifftshift(ref_frames, axes=(-2, -1)), norm="ortho"),
            axes=(-2, -1))
        k0 = jnp.transpose(k0_frames, (1, 2, 0))[None, None].astype(jnp.complex64)
        mask = jax.random.bernoulli(km, 0.35, (1, 1, H, W, T)).astype(jnp.float32)

        out = jax.block_until_ready(
            data_consistency_in_kspace(x, k0, mask, noise_lvl=nl))
        ref = _reference(x, k0, mask, noise_lvl=nl)
        assert out.shape == (1, 1, H, W, T) and out.dtype == jnp.float32
        # bf16 MXU operands + bf16 input slabs => ~1e-2-scale absolute error.
        assert jnp.allclose(out, ref, atol=5e-2, rtol=5e-2), (
            f"mismatch vs jnp.fft reference (H={H},W={W},T={T},noise_lvl={nl}), "
            f"max abs err {float(jnp.max(jnp.abs(out - ref))):.4f}")
    print("KERNEL_OK")
</pallas_src>

<mosaic_0001>
module attributes {stable_mosaic.version = 11 : i64} {
  func.func @_dc_kernel(%arg0: i32, %arg1: memref<16x128xbf16, #tpu.memory_space<vmem>>, %arg2: memref<32x128xbf16, #tpu.memory_space<vmem>>, %arg3: memref<16x128xbf16, #tpu.memory_space<vmem>>, %arg4: memref<32x16xbf16, #tpu.memory_space<vmem>>, %arg5: memref<128x256xbf16, #tpu.memory_space<vmem>>, %arg6: memref<32x16xbf16, #tpu.memory_space<vmem>>, %arg7: memref<32x16xbf16, #tpu.memory_space<vmem>>, %arg8: memref<128x256xbf16, #tpu.memory_space<vmem>>, %arg9: memref<16x128xf32, #tpu.memory_space<vmem>>) attributes {dimension_semantics = [#tpu.dimension_semantics<parallel>], iteration_bounds = array<i64: 1>, scalar_prefetch = 0 : i64, scratch_operands = 0 : i64, tpu.core_type = #tpu.core_type<tc>, window_params = [{transform_indices = @transform_0, window_bounds = array<i64: 16, 128>}, {transform_indices = @transform_1, window_bounds = array<i64: 32, 128>}, {transform_indices = @transform_2, window_bounds = array<i64: 16, 128>}, {pipeline_mode = #tpu.pipeline_mode<synchronous>, transform_indices = @transform_3, window_bounds = array<i64: 32, 16>}, {pipeline_mode = #tpu.pipeline_mode<synchronous>, transform_indices = @transform_4, window_bounds = array<i64: 128, 256>}, {pipeline_mode = #tpu.pipeline_mode<synchronous>, transform_indices = @transform_5, window_bounds = array<i64: 32, 16>}, {pipeline_mode = #tpu.pipeline_mode<synchronous>, transform_indices = @transform_6, window_bounds = array<i64: 32, 16>}, {pipeline_mode = #tpu.pipeline_mode<synchronous>, transform_indices = @transform_7, window_bounds = array<i64: 128, 256>}, {transform_indices = @transform_8, window_bounds = array<i64: 16, 128>}]} {
    %c0 = arith.constant 0 : index
    %c0_0 = arith.constant 0 : index
    %0 = vector.load %arg4[%c0, %c0_0] : memref<32x16xbf16, #tpu.memory_space<vmem>>, vector<32x16xbf16>
    %c0_1 = arith.constant 0 : index
    %c0_2 = arith.constant 0 : index
    %1 = vector.load %arg5[%c0_1, %c0_2] : memref<128x256xbf16, #tpu.memory_space<vmem>>, vector<128x256xbf16>
    %c0_3 = arith.constant 0 : index
    %c0_4 = arith.constant 0 : index
    %2 = vector.load %arg6[%c0_3, %c0_4] : memref<32x16xbf16, #tpu.memory_space<vmem>>, vector<32x16xbf16>
    %c0_5 = arith.constant 0 : index
    %c0_6 = arith.constant 0 : index
    %3 = vector.load %arg7[%c0_5, %c0_6] : memref<32x16xbf16, #tpu.memory_space<vmem>>, vector<32x16xbf16>
    %c0_7 = arith.constant 0 : index
    %c0_8 = arith.constant 0 : index
    %4 = vector.load %arg8[%c0_7, %c0_8] : memref<128x256xbf16, #tpu.memory_space<vmem>>, vector<128x256xbf16>
    %c0_9 = arith.constant 0 : index
    %c0_10 = arith.constant 0 : index
    %5 = vector.load %arg1[%c0_9, %c0_10] : memref<16x128xbf16, #tpu.memory_space<vmem>>, vector<16x128xbf16>
    %cst = arith.constant dense<0.000000e+00> : vector<32x128xf32>
    %6 = tpu.matmul %0, %5, %cst {dimension_numbers = #tpu.dot_dimension_numbers<[1], [0], [0], [1], [0, 0, 1, 1], [], []>} : vector<32x16xbf16>, vector<16x128xbf16>, vector<32x128xf32> -> vector<32x128xf32>
    %7 = arith.truncf %6 : vector<32x128xf32> to vector<32x128xbf16>
    %cst_11 = arith.constant dense<0.000000e+00> : vector<32x256xf32>
    %8 = tpu.matmul %7, %1, %cst_11 {dimension_numbers = #tpu.dot_dimension_numbers<[1], [0], [0], [1], [0, 0, 1, 1], [], []>} : vector<32x128xbf16>, vector<128x256xbf16>, vector<32x256xf32> -> vector<32x256xf32>
    %9 = vector.extract_strided_slice %8 {offsets = [0, 0], sizes = [16, 128], strides = [1, 1]} : vector<32x256xf32> to vector<16x128xf32>
    %10 = vector.extract_strided_slice %8 {offsets = [16, 128], sizes = [16, 128], strides = [1, 1]} : vector<32x256xf32> to vector<16x128xf32>
    %11 = arith.subf %9, %10 : vector<16x128xf32>
    %12 = vector.extract_strided_slice %8 {offsets = [0, 128], sizes = [16, 128], strides = [1, 1]} : vector<32x256xf32> to vector<16x128xf32>
    %13 = vector.extract_strided_slice %8 {offsets = [16, 0], sizes = [16, 128], strides = [1, 1]} : vector<32x256xf32> to vector<16x128xf32>
    %14 = arith.addf %12, %13 : vector<16x128xf32>
    %c0_12 = arith.constant 0 : index
    %c0_13 = arith.constant 0 : index
    %15 = vector.load %arg3[%c0_12, %c0_13] : memref<16x128xbf16, #tpu.memory_space<vmem>>, vector<16x128xbf16>
    %16 = arith.extf %15 : vector<16x128xbf16> to vector<16x128xf32>
    %c0_14 = arith.constant 0 : index
    %c0_15 = arith.constant 0 : index
    %17 = vector.load %arg2[%c0_14, %c0_15] : memref<32x128xbf16, #tpu.memory_space<vmem>>, vector<16x128xbf16>
    %18 = arith.extf %17 : vector<16x128xbf16> to vector<16x128xf32>
    %19 = arith.subf %18, %11 : vector<16x128xf32>
    %20 = arith.mulf %16, %19 : vector<16x128xf32>
    %21 = arith.addf %11, %20 : vector<16x128xf32>
    %c16 = arith.constant 16 : index
    %c0_16 = arith.constant 0 : index
    %22 = vector.load %arg2[%c16, %c0_16] : memref<32x128xbf16, #tpu.memory_space<vmem>>, vector<16x128xbf16>
    %23 = arith.extf %22 : vector<16x128xbf16> to vector<16x128xf32>
    %24 = arith.subf %23, %14 : vector<16x128xf32>
    %25 = arith.mulf %16, %24 : vector<16x128xf32>
    %26 = arith.addf %14, %25 : vector<16x128xf32>
    %27 = arith.truncf %21 : vector<16x128xf32> to vector<16x128xbf16>
    %cst_17 = arith.constant dense<0.000000e+00> : vector<32x128xf32>
    %28 = tpu.matmul %2, %27, %cst_17 {dimension_numbers = #tpu.dot_dimension_numbers<[1], [0], [0], [1], [0, 0, 1, 1], [], []>} : vector<32x16xbf16>, vector<16x128xbf16>, vector<32x128xf32> -> vector<32x128xf32>
    %29 = arith.truncf %26 : vector<16x128xf32> to vector<16x128xbf16>
    %cst_18 = arith.constant dense<0.000000e+00> : vector<32x128xf32>
    %30 = tpu.matmul %3, %29, %cst_18 {dimension_numbers = #tpu.dot_dimension_numbers<[1], [0], [0], [1], [0, 0, 1, 1], [], []>} : vector<32x16xbf16>, vector<16x128xbf16>, vector<32x128xf32> -> vector<32x128xf32>
    %31 = arith.addf %28, %30 : vector<32x128xf32>
    %32 = arith.truncf %31 : vector<32x128xf32> to vector<32x128xbf16>
    %cst_19 = arith.constant dense<0.000000e+00> : vector<32x256xf32>
    %33 = tpu.matmul %32, %4, %cst_19 {dimension_numbers = #tpu.dot_dimension_numbers<[1], [0], [0], [1], [0, 0, 1, 1], [], []>} : vector<32x128xbf16>, vector<128x256xbf16>, vector<32x256xf32> -> vector<32x256xf32>
    %34 = vector.extract_strided_slice %33 {offsets = [0, 0], sizes = [16, 128], strides = [1, 1]} : vector<32x256xf32> to vector<16x128xf32>
    %35 = vector.extract_strided_slice %33 {offsets = [16, 128], sizes = [16, 128], strides = [1, 1]} : vector<32x256xf32> to vector<16x128xf32>
    %36 = arith.subf %34, %35 : vector<16x128xf32>
    %37 = vector.extract_strided_slice %33 {offsets = [0, 128], sizes = [16, 128], strides = [1, 1]} : vector<32x256xf32> to vector<16x128xf32>
    %38 = vector.extract_strided_slice %33 {offsets = [16, 0], sizes = [16, 128], strides = [1, 1]} : vector<32x256xf32> to vector<16x128xf32>
    %39 = arith.addf %37, %38 : vector<16x128xf32>
    %40 = arith.mulf %36, %36 : vector<16x128xf32>
    %41 = arith.mulf %39, %39 : vector<16x128xf32>
    %42 = arith.addf %40, %41 : vector<16x128xf32>
    %43 = math.sqrt %42 : vector<16x128xf32>
    %c0_20 = arith.constant 0 : index
    %c0_21 = arith.constant 0 : index
    %44 = vector.load %arg9[%c0_20, %c0_21] : memref<16x128xf32, #tpu.memory_space<vmem>>, vector<16x128xf32>
    tpu.vector_store %arg9[%c0_20, %c0_21], %43 {strides = array<i32>} : memref<16x128xf32, #tpu.memory_space<vmem>>, vector<16x128xf32>,
    return
  }
  func.func @transform_0(%arg0: i32) -> (i32, i32) {
    %c0_i32 = arith.constant 0 : i32
    %c0_i32_0 = arith.constant 0 : i32
    return %c0_i32, %arg0 : i32, i32
  }
  func.func @transform_1(%arg0: i32) -> (i32, i32) {
    %c0_i32 = arith.constant 0 : i32
    %c0_i32_0 = arith.constant 0 : i32
    return %c0_i32, %arg0 : i32, i32
  }
  func.func @transform_2(%arg0: i32) -> (i32, i32) {
    %c0_i32 = arith.constant 0 : i32
    %c0_i32_0 = arith.constant 0 : i32
    return %c0_i32, %arg0 : i32, i32
  }
  func.func @transform_3(%arg0: i32) -> (i32, i32) {
    %c0_i32 = arith.constant 0 : i32
    %c0_i32_0 = arith.constant 0 : i32
    %c0_i32_1 = arith.constant 0 : i32
    return %c0_i32, %c0_i32_0 : i32, i32
  }
  func.func @transform_4(%arg0: i32) -> (i32, i32) {
    %c0_i32 = arith.constant 0 : i32
    %c0_i32_0 = arith.constant 0 : i32
    %c0_i32_1 = arith.constant 0 : i32
    return %c0_i32, %c0_i32_0 : i32, i32
  }
  func.func @transform_5(%arg0: i32) -> (i32, i32) {
    %c0_i32 = arith.constant 0 : i32
    %c0_i32_0 = arith.constant 0 : i32
    %c0_i32_1 = arith.constant 0 : i32
    return %c0_i32, %c0_i32_0 : i32, i32
  }
  func.func @transform_6(%arg0: i32) -> (i32, i32) {
    %c0_i32 = arith.constant 0 : i32
    %c0_i32_0 = arith.constant 0 : i32
    %c0_i32_1 = arith.constant 0 : i32
    return %c0_i32, %c0_i32_0 : i32, i32
  }
  func.func @transform_7(%arg0: i32) -> (i32, i32) {
    %c0_i32 = arith.constant 0 : i32
    %c0_i32_0 = arith.constant 0 : i32
    %c0_i32_1 = arith.constant 0 : i32
    return %c0_i32, %c0_i32_0 : i32, i32
  }
  func.func @transform_8(%arg0: i32) -> (i32, i32) {
    %c0_i32 = arith.constant 0 : i32
    %c0_i32_0 = arith.constant 0 : i32
    return %c0_i32, %arg0 : i32, i32
  }
}

module attributes {stable_mosaic.version = 11 : i64} {
  func.func @_dc_kernel(%arg0: i32, %arg1: memref<16x128xbf16, #tpu.memory_space<vmem>>, %arg2: memref<32x128xbf16, #tpu.memory_space<vmem>>, %arg3: memref<16x128xbf16, #tpu.memory_space<vmem>>, %arg4: memref<32x16xbf16, #tpu.memory_space<vmem>>, %arg5: memref<128x256xbf16, #tpu.memory_space<vmem>>, %arg6: memref<32x16xbf16, #tpu.memory_space<vmem>>, %arg7: memref<32x16xbf16, #tpu.memory_space<vmem>>, %arg8: memref<128x256xbf16, #tpu.memory_space<vmem>>, %arg9: memref<16x128xf32, #tpu.memory_space<vmem>>) attributes {dimension_semantics = [#tpu.dimension_semantics<parallel>], iteration_bounds = array<i64: 1>, scalar_prefetch = 0 : i64, scratch_operands = 0 : i64, tpu.core_type = #tpu.core_type<tc>, window_params = [{transform_indices = @transform_0, window_bounds = array<i64: 16, 128>}, {transform_indices = @transform_1, window_bounds = array<i64: 32, 128>}, {transform_indices = @transform_2, window_bounds = array<i64: 16, 128>}, {pipeline_mode = #tpu.pipeline_mode<synchronous>, transform_indices = @transform_3, window_bounds = array<i64: 32, 16>}, {pipeline_mode = #tpu.pipeline_mode<synchronous>, transform_indices = @transform_4, window_bounds = array<i64: 128, 256>}, {pipeline_mode = #tpu.pipeline_mode<synchronous>, transform_indices = @transform_5, window_bounds = array<i64: 32, 16>}, {pipeline_mode = #tpu.pipeline_mode<synchronous>, transform_indices = @transform_6, window_bounds = array<i64: 32, 16>}, {pipeline_mode = #tpu.pipeline_mode<synchronous>, transform_indices = @transform_7, window_bounds = array<i64: 128, 256>}, {transform_indices = @transform_8, window_bounds = array<i64: 16, 128>}]} {
    %c0 = arith.constant 0 : index
    %c0_0 = arith.constant 0 : index
    %0 = vector.load %arg4[%c0, %c0_0] : memref<32x16xbf16, #tpu.memory_space<vmem>>, vector<32x16xbf16>
    %c0_1 = arith.constant 0 : index
    %c0_2 = arith.constant 0 : index
    %1 = vector.load %arg5[%c0_1, %c0_2] : memref<128x256xbf16, #tpu.memory_space<vmem>>, vector<128x256xbf16>
    %c0_3 = arith.constant 0 : index
    %c0_4 = arith.constant 0 : index
    %2 = vector.load %arg6[%c0_3, %c0_4] : memref<32x16xbf16, #tpu.memory_space<vmem>>, vector<32x16xbf16>
    %c0_5 = arith.constant 0 : index
    %c0_6 = arith.constant 0 : index
    %3 = vector.load %arg7[%c0_5, %c0_6] : memref<32x16xbf16, #tpu.memory_space<vmem>>, vector<32x16xbf16>
    %c0_7 = arith.constant 0 : index
    %c0_8 = arith.constant 0 : index
    %4 = vector.load %arg8[%c0_7, %c0_8] : memref<128x256xbf16, #tpu.memory_space<vmem>>, vector<128x256xbf16>
    %c0_9 = arith.constant 0 : index
    %c0_10 = arith.constant 0 : index
    %5 = vector.load %arg1[%c0_9, %c0_10] : memref<16x128xbf16, #tpu.memory_space<vmem>>, vector<16x128xbf16>
    %cst = arith.constant dense<0.000000e+00> : vector<32x128xf32>
    %6 = tpu.matmul %0, %5, %cst {dimension_numbers = #tpu.dot_dimension_numbers<[1], [0], [0], [1], [0, 0, 1, 1], [], []>} : vector<32x16xbf16>, vector<16x128xbf16>, vector<32x128xf32> -> vector<32x128xf32>
    %7 = arith.truncf %6 : vector<32x128xf32> to vector<32x128xbf16>
    %cst_11 = arith.constant dense<0.000000e+00> : vector<32x256xf32>
    %8 = tpu.matmul %7, %1, %cst_11 {dimension_numbers = #tpu.dot_dimension_numbers<[1], [0], [0], [1], [0, 0, 1, 1], [], []>} : vector<32x128xbf16>, vector<128x256xbf16>, vector<32x256xf32> -> vector<32x256xf32>
    %9 = vector.extract_strided_slice %8 {offsets = [0, 0], sizes = [16, 128], strides = [1, 1]} : vector<32x256xf32> to vector<16x128xf32>
    %10 = vector.extract_strided_slice %8 {offsets = [16, 128], sizes = [16, 128], strides = [1, 1]} : vector<32x256xf32> to vector<16x128xf32>
    %11 = arith.subf %9, %10 : vector<16x128xf32>
    %12 = vector.extract_strided_slice %8 {offsets = [0, 128], sizes = [16, 128], strides = [1, 1]} : vector<32x256xf32> to vector<16x128xf32>
    %13 = vector.extract_strided_slice %8 {offsets = [16, 0], sizes = [16, 128], strides = [1, 1]} : vector<32x256xf32> to vector<16x128xf32>
    %14 = arith.addf %12, %13 : vector<16x128xf32>
    %c0_12 = arith.constant 0 : index
    %c0_13 = arith.constant 0 : index
    %15 = vector.load %arg3[%c0_12, %c0_13] : memref<16x128xbf16, #tpu.memory_space<vmem>>, vector<16x128xbf16>
    %16 = arith.extf %15 : vector<16x128xbf16> to vector<16x128xf32>
    %c0_14 = arith.constant 0 : index
    %c0_15 = arith.constant 0 : index
    %17 = vector.load %arg2[%c0_14, %c0_15] : memref<32x128xbf16, #tpu.memory_space<vmem>>, vector<16x128xbf16>
    %18 = arith.extf %17 : vector<16x128xbf16> to vector<16x128xf32>
    %19 = arith.subf %18, %11 : vector<16x128xf32>
    %20 = arith.mulf %16, %19 : vector<16x128xf32>
    %21 = arith.addf %11, %20 : vector<16x128xf32>
    %c16 = arith.constant 16 : index
    %c0_16 = arith.constant 0 : index
    %22 = vector.load %arg2[%c16, %c0_16] : memref<32x128xbf16, #tpu.memory_space<vmem>>, vector<16x128xbf16>
    %23 = arith.extf %22 : vector<16x128xbf16> to vector<16x128xf32>
    %24 = arith.subf %23, %14 : vector<16x128xf32>
    %25 = arith.mulf %16, %24 : vector<16x128xf32>
    %26 = arith.addf %14, %25 : vector<16x128xf32>
    %27 = arith.truncf %21 : vector<16x128xf32> to vector<16x128xbf16>
    %cst_17 = arith.constant dense<0.000000e+00> : vector<32x128xf32>
    %28 = tpu.matmul %2, %27, %cst_17 {dimension_numbers = #tpu.dot_dimension_numbers<[1], [0], [0], [1], [0, 0, 1, 1], [], []>} : vector<32x16xbf16>, vector<16x128xbf16>, vector<32x128xf32> -> vector<32x128xf32>
    %29 = arith.truncf %26 : vector<16x128xf32> to vector<16x128xbf16>
    %cst_18 = arith.constant dense<0.000000e+00> : vector<32x128xf32>
    %30 = tpu.matmul %3, %29, %cst_18 {dimension_numbers = #tpu.dot_dimension_numbers<[1], [0], [0], [1], [0, 0, 1, 1], [], []>} : vector<32x16xbf16>, vector<16x128xbf16>, vector<32x128xf32> -> vector<32x128xf32>
    %31 = arith.addf %28, %30 : vector<32x128xf32>
    %32 = arith.truncf %31 : vector<32x128xf32> to vector<32x128xbf16>
    %cst_19 = arith.constant dense<0.000000e+00> : vector<32x256xf32>
    %33 = tpu.matmul %32, %4, %cst_19 {dimension_numbers = #tpu.dot_dimension_numbers<[1], [0], [0], [1], [0, 0, 1, 1], [], []>} : vector<32x128xbf16>, vector<128x256xbf16>, vector<32x256xf32> -> vector<32x256xf32>
    %34 = vector.extract_strided_slice %33 {offsets = [0, 0], sizes = [16, 128], strides = [1, 1]} : vector<32x256xf32> to vector<16x128xf32>
    %35 = vector.extract_strided_slice %33 {offsets = [16, 128], sizes = [16, 128], strides = [1, 1]} : vector<32x256xf32> to vector<16x128xf32>
    %36 = arith.subf %34, %35 : vector<16x128xf32>
    %37 = vector.extract_strided_slice %33 {offsets = [0, 128], sizes = [16, 128], strides = [1, 1]} : vector<32x256xf32> to vector<16x128xf32>
    %38 = vector.extract_strided_slice %33 {offsets = [16, 0], sizes = [16, 128], strides = [1, 1]} : vector<32x256xf32> to vector<16x128xf32>
    %39 = arith.addf %37, %38 : vector<16x128xf32>
    %40 = arith.mulf %36, %36 : vector<16x128xf32>
    %41 = arith.mulf %39, %39 : vector<16x128xf32>
    %42 = arith.addf %40, %41 : vector<16x128xf32>
    %43 = math.sqrt %42 : vector<16x128xf32>
    %c0_20 = arith.constant 0 : index
    %c0_21 = arith.constant 0 : index
    %44 = vector.load %arg9[%c0_20, %c0_21] : memref<16x128xf32, #tpu.memory_space<vmem>>, vector<16x128xf32>
    tpu.vector_store %arg9[%c0_20, %c0_21], %43 {strides = array<i32>} : memref<16x128xf32, #tpu.memory_space<vmem>>, vector<16x128xf32>,
    return
  }
  func.func @transform_0(%arg0: i32) -> (i32, i32) {
    %c0_i32 = arith.constant 0 : i32
    %c0_i32_0 = arith.constant 0 : i32
    return %c0_i32, %arg0 : i32, i32
  }
  func.func @transform_1(%arg0: i32) -> (i32, i32) {
    %c0_i32 = arith.constant 0 : i32
    %c0_i32_0 = arith.constant 0 : i32
    return %c0_i32, %arg0 : i32, i32
  }
  func.func @transform_2(%arg0: i32) -> (i32, i32) {
    %c0_i32 = arith.constant 0 : i32
    %c0_i32_0 = arith.constant 0 : i32
    return %c0_i32, %arg0 : i32, i32
  }
  func.func @transform_3(%arg0: i32) -> (i32, i32) {
    %c0_i32 = arith.constant 0 : i32
    %c0_i32_0 = arith.constant 0 : i32
    %c0_i32_1 = arith.constant 0 : i32
    return %c0_i32, %c0_i32_0 : i32, i32
  }
  func.func @transform_4(%arg0: i32) -> (i32, i32) {
    %c0_i32 = arith.constant 0 : i32
    %c0_i32_0 = arith.constant 0 : i32
    %c0_i32_1 = arith.constant 0 : i32
    return %c0_i32, %c0_i32_0 : i32, i32
  }
  func.func @transform_5(%arg0: i32) -> (i32, i32) {
    %c0_i32 = arith.constant 0 : i32
    %c0_i32_0 = arith.constant 0 : i32
    %c0_i32_1 = arith.constant 0 : i32
    return %c0_i32, %c0_i32_0 : i32, i32
  }
  func.func @transform_6(%arg0: i32) -> (i32, i32) {
    %c0_i32 = arith.constant 0 : i32
    %c0_i32_0 = arith.constant 0 : i32
    %c0_i32_1 = arith.constant 0 : i32
    return %c0_i32, %c0_i32_0 : i32, i32
  }
  func.func @transform_7(%arg0: i32) -> (i32, i32) {
    %c0_i32 = arith.constant 0 : i32
    %c0_i32_0 = arith.constant 0 : i32
    %c0_i32_1 = arith.constant 0 : i32
    return %c0_i32, %c0_i32_0 : i32, i32
  }
  func.func @transform_8(%arg0: i32) -> (i32, i32) {
    %c0_i32 = arith.constant 0 : i32
    %c0_i32_0 = arith.constant 0 : i32
    return %c0_i32, %arg0 : i32, i32
  }
}

</mosaic_0001>

<bundles_post_ra>
// kernel: tpu_custom_call.1
= control target key start
LH: loop header
LB: loop body
LE: loop exit
PB: predicated region body
PF: predicated region fallthrough
CT: control target
= control target key end

     0   :  { %13 = vsyncpa [#allocation3], 0  ;;  %s976_s0 = inlined_call_operand.vmem [shape: bf16[16,128], index: 0, kind: input, shape index: {}]   ;;  %s977_s1 = inlined_call_operand.vmem [shape: bf16[32,128], index: 1, kind: input, shape index: {}]   ;;  %s978_s2 = inlined_call_operand.vmem [shape: bf16[16,128], index: 2, kind: input, shape index: {}]   ;;  %s979_s3 = inlined_call_operand.vmem [shape: bf16[32,16], index: 3, kind: input, shape index: {}]   ;;  %s980_s4 = inlined_call_operand.hbm [shape: bf16[128,256], index: 4, kind: input, shape index: {}]   ;;  %s981_s5 = inlined_call_operand.vmem [shape: bf16[32,16], index: 5, kind: input, shape index: {}]   ;;  %s982_s6 = inlined_call_operand.vmem [shape: bf16[32,16], index: 6, kind: input, shape index: {}]   ;;  %s983_s7 = inlined_call_operand.hbm [shape: bf16[128,256], index: 7, kind: input, shape index: {}]   ;;  %s984_s8 = inlined_call_operand.hbm [shape: f32[16,128], index: 8, kind: output, shape index: {}]  }
   0x1   :  { %14 = vsyncpa [#allocation6], 0 }
   0x2   :  { %15 = vsyncpa [#allocation4], 0  ;;  %s867_s27 = smov [#allocation2]  }
   0x3   :  { %s29_s28 = sshll.u32 %s867_s27, 4  ;;  %s30_s28 = int_to_ptr.vmem [resolvable:$true] %s29_s28 }
   0x4   :  { %s809_s29 = scalar_lea.vmem %s30_s28, 2048  ;;  %p814_p1 = scmp.lt.s32.totalorder %s30_s28, %s30_s28 }
   0x5   :  { %p810_p0 = scmp.ne.s32.totalorder %s30_s28, %s809_s29  ;;  %p815_p2 = scmp.lt.s32.totalorder %s809_s29, %s809_s29 }
   0x7   :  { %p816_p3 = por %p815_p2, %p814_p1 }
   0x9   :  { %p817_p4 = pnand %p816_p3, %p810_p0 }
   0xb   :  { %820 = shalt.err (!%p817_p4)
}
   0xc   :  { %s868_s30 = smov 128   ;;  %s869_s9 = smov 8  }
   0xd   :  { %35 = dma.hbm_to_vmem [thread:$0]  %s980_s4, 2048, %s30_s28, [#allocation3], %s868_s30, %s868_s30, %s869_s9  }
   0xe   :  { %s870_s12 = smov [#allocation5]  }
   0xf   :  { %s45_s13 = sshll.u32 %s870_s12, 4  ;;  %s46_s13 = int_to_ptr.vmem [resolvable:$true] %s45_s13 }
  0x10   :  { %s829_s14 = scalar_lea.vmem %s46_s13, 2048  ;;  %p834_p6 = scmp.lt.s32.totalorder %s46_s13, %s46_s13 }
  0x11   :  { %p830_p5 = scmp.ne.s32.totalorder %s46_s13, %s829_s14  ;;  %p835_p7 = scmp.lt.s32.totalorder %s829_s14, %s829_s14 }
  0x13   :  { %p836_p8 = por %p835_p7, %p834_p6 }
  0x15   :  { %p837_p9 = pnand %p836_p8, %p830_p5 }
  0x17   :  { %840 = shalt.err (!%p837_p9)
}
  0x18   :  { %51 = dma.hbm_to_vmem [thread:$0]  %s983_s7, 2048, %s46_s13, [#allocation6], %s868_s30, %s868_s30, %s869_s9  }
  0x19   :  { %861 = dma.done.wait [#allocation3], 2048  }
  0x1a   :  { %862 = vsyncadd [#allocation3], 4294965248 }
  0x1b   :  { %863 = dma.done.wait [#allocation6], 2048  }
  0x1c   :  { %864 = vsyncadd [#allocation6], 4294965248  ;;  %v742_v0 = vld [vmem:[%s976_s0] sm:$0xff]   ;;  %vm121_vm0 = vcmask 130048   ;;  %v744_v2 = vld [vmem:[%s979_s3 + $0x8] sm:$0xff]   ;;  %v871_v19 = vmov 0  }
  0x1d   :  { %v743_v1 = vld [vmem:[%s979_s3] sm:$0xff]   ;;  %718 = vmatprep.subr.bf16.mxu1 %v742_v0  ;;  %v745_v3 = vld [vmem:[#allocation2 + $0x70] ss:$8 sps:$4 sm:$0xff]   ;;  %v747_v4 = vld [vmem:[#allocation2 + $0x74] ss:$8 sps:$4 sm:$0xff]  }
  0x1e   :  { %719 = vmatpush3.bf16.msra.mxu1 %v742_v0  ;;  %720 = vmatprep.mubr.msk.bf16.mxu1 %vm121_vm0, %v743_v1  ;;  %v750_v5 = vld [vmem:[#allocation2 + $0x64] ss:$8 sps:$4 sm:$0xff]   ;;  %v748_v6 = vld [vmem:[#allocation2 + $0x60] ss:$8 sps:$4 sm:$0xff]   ;;  %v753_v7 = vld [vmem:[#allocation2 + $0x54] ss:$8 sps:$4 sm:$0xff]  }
  0x1f   :  { %259 = vmatprep.subr.bf16.mxu1 %v747_v4  ;;  %v751_v8 = vld [vmem:[#allocation2 + $0x50] ss:$8 sps:$4 sm:$0xff]   ;;  %v756_v9 = vld [vmem:[#allocation2 + $0x44] ss:$8 sps:$4 sm:$0xff]   ;;  %v754_v10 = vld [vmem:[#allocation2 + $0x40] ss:$8 sps:$4 sm:$0xff]  }
  0x20   :  { %v759_v11 = vld [vmem:[#allocation2 + $0x34] ss:$8 sps:$4 sm:$0xff]   ;;  %v757_v12 = vld [vmem:[#allocation2 + $0x30] ss:$8 sps:$4 sm:$0xff]   ;;  %v762_v13 = vld [vmem:[#allocation2 + $0x24] ss:$8 sps:$4 sm:$0xff]  }
  0x21   :  { %721 = vmatmul.mubr.msk.bf16.vlgmr.msra.gmra.mxu1 %vm121_vm0, %v744_v2  ;;  %v760_v14 = vld [vmem:[#allocation2 + $0x20] ss:$8 sps:$4 sm:$0xff]   ;;  %v765_v15 = vld [vmem:[#allocation2 + $0x14] ss:$8 sps:$4 sm:$0xff]   ;;  %v763_v16 = vld [vmem:[#allocation2 + $0x10] ss:$8 sps:$4 sm:$0xff]  }
  0x22   :  { %260 = vmatpush1.bf16.msra.mxu1 %v745_v3  ;;  %v768_v17 = vld [vmem:[#allocation2 + $0x4] ss:$8 sps:$4 sm:$0xff]   ;;  %v766_v18 = vld [vmem:[#allocation2] ss:$8 sps:$4 sm:$0xff]   ;;  %291 = vmatprep.mubr.bf16.mxu1 %v871_v19  ;;  %v775_v0 = vld [vmem:[#allocation5 + $0x74] ss:$8 sps:$4 sm:$0xff]  }
  0x23   :  { %261 = vmatprep.subr.bf16.mxu1 %v750_v5  ;;  %v769_v26 = vld [vmem:[%s982_s6] sm:$0xff]   ;;  %v708_v30 = vld [vmem:[%s977_s1 + $0x8] sm:$0xff]   ;;  %v773_v2 = vld [vmem:[#allocation5 + $0x70] ss:$8 sps:$4 sm:$0xff]  }
  0x24   :  { %726 = vmatprep.mubr.msk.bf16.mxu0 %vm121_vm0, %v769_v26  ;;  %v701_v32 = vld [vmem:[%s977_s1] sm:$0xff]   ;;  %v706_v33 = vunpack.c.l.bf16 %v708_v30  ;;  %v707_v42 = vunpack.c.h.bf16 %v708_v30  ;;  %v770_v62 = vld [vmem:[%s982_s6 + $0x8] sm:$0xff]   ;;  %v781_v5 = vld [vmem:[#allocation5 + $0x54] ss:$8 sps:$4 sm:$0xff]  }
  0x25   :  { %v697_v35 = vld [vmem:[%s978_s2] sm:$0xff]   ;;  %v702_v37 = vunpack.c.l.bf16 %v701_v32  ;;  %v703_v47 = vunpack.c.h.bf16 %v701_v32  ;;  %v772_v1 = vld [vmem:[%s981_s5 + $0x8] sm:$0xff]  }
  0x26   :  { %262 = vmatpush1.bf16.msra.mxu1 %v748_v6  ;;  %v698_v39 = vunpack.c.l.bf16 %v697_v35  ;;  %v699_v46 = vunpack.c.h.bf16 %v697_v35  ;;  %v771_v63 = vld [vmem:[%s981_s5] sm:$0xff]   ;;  %v779_v6 = vld [vmem:[#allocation5 + $0x50] ss:$8 sps:$4 sm:$0xff]   ;;  %s872_s5 = smov [#allocation7]  }
  0x27   :  { %263 = vmatprep.subr.bf16.mxu1 %v753_v7  ;;  %v778_v3 = vld [vmem:[#allocation5 + $0x64] ss:$8 sps:$4 sm:$0xff]   ;;  %v776_v4 = vld [vmem:[#allocation5 + $0x60] ss:$8 sps:$4 sm:$0xff]   ;;  %s638_s6 = sshll.u32 %s872_s5, 4  ;;  %s639_s6 = int_to_ptr.vmem [resolvable:$true] %s638_s6 }
  0x28   :  { %v784_v7 = vld [vmem:[#allocation5 + $0x44] ss:$8 sps:$4 sm:$0xff]   ;;  %s841_s11 = scalar_lea.vmem %s639_s6, 256  ;;  %p846_p11 = scmp.lt.s32.totalorder %s639_s6, %s639_s6 }
  0x29   :  { %p842_p10 = scmp.ne.s32.totalorder %s639_s6, %s841_s11  ;;  %p847_p12 = scmp.lt.s32.totalorder %s841_s11, %s841_s11 }
  0x2a   :  { %264 = vmatpush1.bf16.msra.mxu1 %v751_v8  ;;  %v782_v8 = vld [vmem:[#allocation5 + $0x40] ss:$8 sps:$4 sm:$0xff]  }
  0x2b   :  { %265 = vmatprep.subr.bf16.mxu1 %v756_v9  ;;  %v787_v9 = vld [vmem:[#allocation5 + $0x34] ss:$8 sps:$4 sm:$0xff]   ;;  %p848_p13 = por %p847_p12, %p846_p11 }
  0x2d   :  { %p849_p0 = pnand %p848_p13, %p842_p10 }
  0x2e   :  { %266 = vmatpush1.bf16.msra.mxu1 %v754_v10  ;;  %v785_v10 = vld [vmem:[#allocation5 + $0x30] ss:$8 sps:$4 sm:$0xff]  }
  0x2f   :  { %267 = vmatprep.subr.bf16.mxu1 %v759_v11  ;;  %v790_v11 = vld [vmem:[#allocation5 + $0x24] ss:$8 sps:$4 sm:$0xff]  }
  0x32   :  { %268 = vmatpush1.bf16.msra.mxu1 %v757_v12  ;;  %v788_v12 = vld [vmem:[#allocation5 + $0x20] ss:$8 sps:$4 sm:$0xff]  }
  0x33   :  { %269 = vmatprep.subr.bf16.mxu1 %v762_v13  ;;  %v793_v13 = vld [vmem:[#allocation5 + $0x14] ss:$8 sps:$4 sm:$0xff]  }
  0x36   :  { %270 = vmatpush1.bf16.msra.mxu1 %v760_v14  ;;  %v791_v14 = vld [vmem:[#allocation5 + $0x10] ss:$8 sps:$4 sm:$0xff]  }
  0x37   :  { %271 = vmatprep.subr.bf16.mxu1 %v765_v15  ;;  %v796_v15 = vld [vmem:[#allocation5 + $0x4] ss:$8 sps:$4 sm:$0xff]  }
  0x3a   :  { %272 = vmatpush1.bf16.msra.mxu1 %v763_v16  ;;  %v794_v16 = vld [vmem:[#allocation5] ss:$8 sps:$4 sm:$0xff]  }
  0x3b   :  { %273 = vmatprep.subr.bf16.mxu1 %v768_v17 }
  0x3e   :  { %274 = vmatpush1.bf16.msra.mxu1 %v766_v18 }
  0xe1   :  { %v722_v20 = vpop.f32.mrf.mxu1 }
  0xe3   :  { %v162_v21 = vpop.f32.mrf.mxu1 }
  0xe5   :  { %v723_v22 = vpop.f32.mrf.mxu1 }
  0xe6   :  { %v178_v25 = vpack.c.bf16 %v723_v22, %v722_v20 }
  0xe7   :  { %v165_v23 = vpop.f32.mrf.mxu1 }
  0xe8   :  { %v177_v24 = vpack.c.bf16 %v165_v23, %v162_v21 }
  0xea   :  { %292 = vmatmul.mubr.bf16.vlgmr.msra.gmra.mxu1 %v177_v24 }
  0xeb   :  { %301 = vmatprep.mubr.bf16.mxu1 %v871_v19 }
  0xf2   :  { %302 = vmatmul.mubr.bf16.gmra.mxu1 %v178_v25 }
 0x1aa   :  { %v293_v27 = vpop.f32.mrf.mxu1 }
 0x1ac   :  { %v295_v28 = vpop.f32.mrf.mxu1 }
 0x1ae   :  { %v297_v29 = vpop.f32.mrf.mxu1 }
 0x1b0   :  { %v299_v31 = vpop.f32.mrf.mxu1 }
 0x1b2   :  { %v303_v34 = vpop.f32.mrf.mxu1 }
 0x1b3   :  { %v314_v36 = vadd.f32 %v303_v34, %v295_v28 }
 0x1b4   :  { %v305_v38 = vpop.f32.mrf.mxu1 }
 0x1b5   :  { %v334_v40 = vsub.f32 %v706_v33, %v314_v36  ;;  %v312_v41 = vsub.f32 %v293_v27, %v305_v38 }
 0x1b6   :  { %v307_v43 = vpop.f32.mrf.mxu1 }
 0x1b7   :  { %v324_v44 = vsub.f32 %v702_v37, %v312_v41  ;;  %v315_v45 = vadd.f32 %v307_v43, %v299_v31  ;;  %v336_v49 = vmul.f32 %v698_v39, %v334_v40 }
 0x1b8   :  { %v309_v48 = vpop.f32.mrf.mxu1 }
 0x1b9   :  { %v335_v50 = vsub.f32 %v707_v42, %v315_v45  ;;  %v313_v51 = vsub.f32 %v297_v29, %v309_v48  ;;  %v326_v52 = vmul.f32 %v698_v39, %v324_v44  ;;  %v338_v55 = vadd.f32 %v336_v49, %v314_v36 }
 0x1bb   :  { %v337_v53 = vmul.f32 %v699_v46, %v335_v50  ;;  %v325_v54 = vsub.f32 %v703_v47, %v313_v51  ;;  %v328_v58 = vadd.f32 %v326_v52, %v312_v41 }
 0x1bd   :  { %v339_v56 = vadd.f32 %v337_v53, %v315_v45  ;;  %v327_v57 = vmul.f32 %v699_v46, %v325_v54 }
 0x1bf   :  { %v329_v59 = vadd.f32 %v327_v57, %v313_v51  ;;  %v341_v60 = vpack.c.bf16 %v339_v56, %v338_v55 }
 0x1c1   :  { %724 = vmatprep.subr.bf16.mxu0 %v341_v60  ;;  %v340_v61 = vpack.c.bf16 %v329_v59, %v328_v58 }
 0x1c2   :  { %725 = vmatpush3.bf16.msra.mxu0 %v341_v60 }
 0x1c3   :  { %730 = vmatprep.subr.bf16.mxu0 %v340_v61 }
 0x1c5   :  { %727 = vmatmul.mubr.msk.bf16.vlgmr.msra.gmra.mxu0 %vm121_vm0, %v770_v62 }
 0x1c6   :  { %731 = vmatpush3.bf16.msra.mxu0 %v340_v61  ;;  %732 = vmatprep.mubr.msk.bf16.mxu0 %vm121_vm0, %v771_v63 }
 0x1c7   :  { %554 = vmatprep.subr.bf16.mxu0 %v775_v0 }
 0x1cd   :  { %733 = vmatmul.mubr.msk.bf16.vlgmr.msra.gmra.mxu0 %vm121_vm0, %v772_v1 }
 0x1ce   :  { %555 = vmatpush1.bf16.msra.mxu0 %v773_v2  ;;  %586 = vmatprep.mubr.bf16.mxu0 %v871_v19 }
 0x1cf   :  { %556 = vmatprep.subr.bf16.mxu0 %v778_v3 }
 0x1d2   :  { %557 = vmatpush1.bf16.msra.mxu0 %v776_v4 }
 0x1d3   :  { %558 = vmatprep.subr.bf16.mxu0 %v781_v5 }
 0x1d6   :  { %559 = vmatpush1.bf16.msra.mxu0 %v779_v6 }
 0x1d7   :  { %560 = vmatprep.subr.bf16.mxu0 %v784_v7 }
 0x1da   :  { %561 = vmatpush1.bf16.msra.mxu0 %v782_v8 }
 0x1db   :  { %562 = vmatprep.subr.bf16.mxu0 %v787_v9 }
 0x1de   :  { %563 = vmatpush1.bf16.msra.mxu0 %v785_v10 }
 0x1df   :  { %564 = vmatprep.subr.bf16.mxu0 %v790_v11 }
 0x1e2   :  { %565 = vmatpush1.bf16.msra.mxu0 %v788_v12 }
 0x1e3   :  { %566 = vmatprep.subr.bf16.mxu0 %v793_v13 }
 0x1e6   :  { %567 = vmatpush1.bf16.msra.mxu0 %v791_v14 }
 0x1e7   :  { %568 = vmatprep.subr.bf16.mxu0 %v796_v15 }
 0x1ea   :  { %569 = vmatpush1.bf16.msra.mxu0 %v794_v16 }
 0x285   :  { %v728_v17 = vpop.f32.mrf.mxu0 }
 0x287   :  { %v392_v18 = vpop.f32.mrf.mxu0 }
 0x289   :  { %v729_v20 = vpop.f32.mrf.mxu0 }
 0x28b   :  { %v395_v21 = vpop.f32.mrf.mxu0 }
 0x28d   :  { %v734_v22 = vpop.f32.mrf.mxu0 }
 0x28e   :  { %v466_v30 = vadd.f32 %v734_v22, %v728_v17 }
 0x28f   :  { %v457_v23 = vpop.f32.mrf.mxu0 }
 0x290   :  { %v458_v26 = vadd.f32 %v457_v23, %v392_v18 }
 0x291   :  { %v735_v24 = vpop.f32.mrf.mxu0 }
 0x292   :  { %v469_v29 = vadd.f32 %v735_v24, %v729_v20 }
 0x293   :  { %v460_v25 = vpop.f32.mrf.mxu0 }
 0x294   :  { %v461_v27 = vadd.f32 %v460_v25, %v395_v21  ;;  %v473_v31 = vpack.c.bf16 %v469_v29, %v466_v30 }
 0x296   :  { %v472_v28 = vpack.c.bf16 %v461_v27, %v458_v26 }
 0x298   :  { %587 = vmatmul.mubr.bf16.vlgmr.msra.gmra.mxu0 %v472_v28 }
 0x299   :  { %596 = vmatprep.mubr.bf16.mxu0 %v871_v19 }
 0x2a0   :  { %597 = vmatmul.mubr.bf16.gmra.mxu0 %v473_v31 }
 0x358   :  { %v588_v32 = vpop.f32.mrf.mxu0 }
 0x35a   :  { %v590_v33 = vpop.f32.mrf.mxu0 }
 0x35c   :  { %v592_v34 = vpop.f32.mrf.mxu0 }
 0x35e   :  { %v594_v35 = vpop.f32.mrf.mxu0 }
 0x360   :  { %v598_v36 = vpop.f32.mrf.mxu0 }
 0x361   :  { %v609_v37 = vadd.f32 %v598_v36, %v590_v33 }
 0x362   :  { %v600_v38 = vpop.f32.mrf.mxu0 }
 0x363   :  { %v607_v39 = vsub.f32 %v588_v32, %v600_v38  ;;  %v613_v41 = vmul.f32 %v609_v37, %v609_v37 }
 0x364   :  { %v602_v40 = vpop.f32.mrf.mxu0 }
 0x365   :  { %v611_v42 = vmul.f32 %v607_v39, %v607_v39  ;;  %v610_v43 = vadd.f32 %v602_v40, %v594_v35 }
 0x366   :  { %v604_v44 = vpop.f32.mrf.mxu0 }
 0x367   :  { %v615_v45 = vadd.f32 %v613_v41, %v611_v42  ;;  %v608_v46 = vsub.f32 %v592_v34, %v604_v44  ;;  %v614_v19 = vmul.f32 %v610_v43, %v610_v43 }
 0x369   :  { %797 = vrsqrt.f32 %v615_v45  ;;  %v612_v47 = vmul.f32 %v608_v46, %v608_v46  ;;  %vm619_vm1 = vcmp.eq.f32.partialorder %v615_v45, inf  ;;  %v622_v51 = vand.u32 2147483648, %v615_v45 }
 0x36a   :  { %vm621_vm2 = vcmp.eq.f32.partialorder %v615_v45, 0.0 }
 0x36b   :  { %v616_v48 = vadd.f32 %v614_v19, %v612_v47 }
 0x36d   :  { %799 = vrsqrt.f32 %v616_v48  ;;  %vm626_vm3 = vcmp.eq.f32.partialorder %v616_v48, inf  ;;  %v629_v56 = vand.u32 2147483648, %v616_v48  ;;  %vm628_vm4 = vcmp.eq.f32.partialorder %v616_v48, 0.0 }
 0x376   :  { %v798_v49 = vpop.eup %797 }
 0x377   :  { %v618_v50 = vmul.f32 %v798_v49, %v615_v45 }
 0x379   :  { %v620_v52 = vsel %vm619_vm1, %v615_v45, %v618_v50 }
 0x37a   :  { %v800_v53 = vpop.eup %799  ;;  %v623_v54 = vsel %vm621_vm2, %v622_v51, %v620_v52 }
 0x37b   :  { %v625_v55 = vmul.f32 %v800_v53, %v616_v48  ;;  %631 = vst [vmem:[#allocation7] sm:$0xff] %v623_v54 }
 0x37d   :  { %v627_v57 = vsel %vm626_vm3, %v616_v48, %v625_v55 }
 0x37e   :  { %v630_v58 = vsel %vm628_vm4, %v629_v56, %v627_v57 }
 0x37f   :  { %632 = vst [vmem:[#allocation7 + $0x8] sm:$0xff] %v630_v58 }
 0x380   :  { %852 = shalt.err (!%p849_p0)
}
 0x381   :  { %644 = dma.vmem_to_hbm [thread:$0]  %s639_s6, 256, %s984_s8, [#allocation4], %s868_s30, %s868_s30, %s869_s9  }
 0x382   :  { %865 = dma.done.wait [#allocation4], 256  }
 0x383   :  { %866 = vsyncadd [#allocation4], 4294967040 }
 0x384   :  { %648 = vsyncpa [#allocation3], 1 }
 0x385   :  { %649 = vsyncpa [#allocation6], 1 }
 0x386   :  { %650 = vsyncpa [#allocation4], 1 }

// kernel: tpu_custom_call.1
= control target key start
LH: loop header
LB: loop body
LE: loop exit
PB: predicated region body
PF: predicated region fallthrough
CT: control target
= control target key end

     0   :  { %13 = vsyncpa [#allocation3], 0  ;;  %s976_s0 = inlined_call_operand.vmem [shape: bf16[16,128], index: 0, kind: input, shape index: {}]   ;;  %s977_s1 = inlined_call_operand.vmem [shape: bf16[32,128], index: 1, kind: input, shape index: {}]   ;;  %s978_s2 = inlined_call_operand.vmem [shape: bf16[16,128], index: 2, kind: input, shape index: {}]   ;;  %s979_s3 = inlined_call_operand.vmem [shape: bf16[32,16], index: 3, kind: input, shape index: {}]   ;;  %s980_s4 = inlined_call_operand.hbm [shape: bf16[128,256], index: 4, kind: input, shape index: {}]   ;;  %s981_s5 = inlined_call_operand.vmem [shape: bf16[32,16], index: 5, kind: input, shape index: {}]   ;;  %s982_s6 = inlined_call_operand.vmem [shape: bf16[32,16], index: 6, kind: input, shape index: {}]   ;;  %s983_s7 = inlined_call_operand.hbm [shape: bf16[128,256], index: 7, kind: input, shape index: {}]   ;;  %s984_s8 = inlined_call_operand.hbm [shape: f32[16,128], index: 8, kind: output, shape index: {}]  }
   0x1   :  { %14 = vsyncpa [#allocation6], 0 }
   0x2   :  { %15 = vsyncpa [#allocation4], 0  ;;  %s867_s27 = smov [#allocation2]  }
   0x3   :  { %s29_s28 = sshll.u32 %s867_s27, 4  ;;  %s30_s28 = int_to_ptr.vmem [resolvable:$true] %s29_s28 }
   0x4   :  { %s809_s29 = scalar_lea.vmem %s30_s28, 2048  ;;  %p814_p1 = scmp.lt.s32.totalorder %s30_s28, %s30_s28 }
   0x5   :  { %p810_p0 = scmp.ne.s32.totalorder %s30_s28, %s809_s29  ;;  %p815_p2 = scmp.lt.s32.totalorder %s809_s29, %s809_s29 }
   0x7   :  { %p816_p3 = por %p815_p2, %p814_p1 }
   0x9   :  { %p817_p4 = pnand %p816_p3, %p810_p0 }
   0xb   :  { %820 = shalt.err (!%p817_p4)
}
   0xc   :  { %s868_s30 = smov 128   ;;  %s869_s9 = smov 8  }
   0xd   :  { %35 = dma.hbm_to_vmem [thread:$0]  %s980_s4, 2048, %s30_s28, [#allocation3], %s868_s30, %s868_s30, %s869_s9  }
   0xe   :  { %s870_s12 = smov [#allocation5]  }
   0xf   :  { %s45_s13 = sshll.u32 %s870_s12, 4  ;;  %s46_s13 = int_to_ptr.vmem [resolvable:$true] %s45_s13 }
  0x10   :  { %s829_s14 = scalar_lea.vmem %s46_s13, 2048  ;;  %p834_p6 = scmp.lt.s32.totalorder %s46_s13, %s46_s13 }
  0x11   :  { %p830_p5 = scmp.ne.s32.totalorder %s46_s13, %s829_s14  ;;  %p835_p7 = scmp.lt.s32.totalorder %s829_s14, %s829_s14 }
  0x13   :  { %p836_p8 = por %p835_p7, %p834_p6 }
  0x15   :  { %p837_p9 = pnand %p836_p8, %p830_p5 }
  0x17   :  { %840 = shalt.err (!%p837_p9)
}
  0x18   :  { %51 = dma.hbm_to_vmem [thread:$0]  %s983_s7, 2048, %s46_s13, [#allocation6], %s868_s30, %s868_s30, %s869_s9  }
  0x19   :  { %861 = dma.done.wait [#allocation3], 2048  }
  0x1a   :  { %862 = vsyncadd [#allocation3], 4294965248 }
  0x1b   :  { %863 = dma.done.wait [#allocation6], 2048  }
  0x1c   :  { %864 = vsyncadd [#allocation6], 4294965248  ;;  %v742_v0 = vld [vmem:[%s976_s0] sm:$0xff]   ;;  %vm121_vm0 = vcmask 130048   ;;  %v744_v2 = vld [vmem:[%s979_s3 + $0x8] sm:$0xff]   ;;  %v871_v19 = vmov 0  }
  0x1d   :  { %v743_v1 = vld [vmem:[%s979_s3] sm:$0xff]   ;;  %718 = vmatprep.subr.bf16.mxu1 %v742_v0  ;;  %v745_v3 = vld [vmem:[#allocation2 + $0x70] ss:$8 sps:$4 sm:$0xff]   ;;  %v747_v4 = vld [vmem:[#allocation2 + $0x74] ss:$8 sps:$4 sm:$0xff]  }
  0x1e   :  { %719 = vmatpush3.bf16.msra.mxu1 %v742_v0  ;;  %720 = vmatprep.mubr.msk.bf16.mxu1 %vm121_vm0, %v743_v1  ;;  %v750_v5 = vld [vmem:[#allocation2 + $0x64] ss:$8 sps:$4 sm:$0xff]   ;;  %v748_v6 = vld [vmem:[#allocation2 + $0x60] ss:$8 sps:$4 sm:$0xff]   ;;  %v753_v7 = vld [vmem:[#allocation2 + $0x54] ss:$8 sps:$4 sm:$0xff]  }
  0x1f   :  { %259 = vmatprep.subr.bf16.mxu1 %v747_v4  ;;  %v751_v8 = vld [vmem:[#allocation2 + $0x50] ss:$8 sps:$4 sm:$0xff]   ;;  %v756_v9 = vld [vmem:[#allocation2 + $0x44] ss:$8 sps:$4 sm:$0xff]   ;;  %v754_v10 = vld [vmem:[#allocation2 + $0x40] ss:$8 sps:$4 sm:$0xff]  }
  0x20   :  { %v759_v11 = vld [vmem:[#allocation2 + $0x34] ss:$8 sps:$4 sm:$0xff]   ;;  %v757_v12 = vld [vmem:[#allocation2 + $0x30] ss:$8 sps:$4 sm:$0xff]   ;;  %v762_v13 = vld [vmem:[#allocation2 + $0x24] ss:$8 sps:$4 sm:$0xff]  }
  0x21   :  { %721 = vmatmul.mubr.msk.bf16.vlgmr.msra.gmra.mxu1 %vm121_vm0, %v744_v2  ;;  %v760_v14 = vld [vmem:[#allocation2 + $0x20] ss:$8 sps:$4 sm:$0xff]   ;;  %v765_v15 = vld [vmem:[#allocation2 + $0x14] ss:$8 sps:$4 sm:$0xff]   ;;  %v763_v16 = vld [vmem:[#allocation2 + $0x10] ss:$8 sps:$4 sm:$0xff]  }
  0x22   :  { %260 = vmatpush1.bf16.msra.mxu1 %v745_v3  ;;  %v768_v17 = vld [vmem:[#allocation2 + $0x4] ss:$8 sps:$4 sm:$0xff]   ;;  %v766_v18 = vld [vmem:[#allocation2] ss:$8 sps:$4 sm:$0xff]   ;;  %291 = vmatprep.mubr.bf16.mxu1 %v871_v19  ;;  %v775_v0 = vld [vmem:[#allocation5 + $0x74] ss:$8 sps:$4 sm:$0xff]  }
  0x23   :  { %261 = vmatprep.subr.bf16.mxu1 %v750_v5  ;;  %v769_v26 = vld [vmem:[%s982_s6] sm:$0xff]   ;;  %v708_v30 = vld [vmem:[%s977_s1 + $0x8] sm:$0xff]   ;;  %v773_v2 = vld [vmem:[#allocation5 + $0x70] ss:$8 sps:$4 sm:$0xff]  }
  0x24   :  { %726 = vmatprep.mubr.msk.bf16.mxu0 %vm121_vm0, %v769_v26  ;;  %v701_v32 = vld [vmem:[%s977_s1] sm:$0xff]   ;;  %v706_v33 = vunpack.c.l.bf16 %v708_v30  ;;  %v707_v42 = vunpack.c.h.bf16 %v708_v30  ;;  %v770_v62 = vld [vmem:[%s982_s6 + $0x8] sm:$0xff]   ;;  %v781_v5 = vld [vmem:[#allocation5 + $0x54] ss:$8 sps:$4 sm:$0xff]  }
  0x25   :  { %v697_v35 = vld [vmem:[%s978_s2] sm:$0xff]   ;;  %v702_v37 = vunpack.c.l.bf16 %v701_v32  ;;  %v703_v47 = vunpack.c.h.bf16 %v701_v32  ;;  %v772_v1 = vld [vmem:[%s981_s5 + $0x8] sm:$0xff]  }
  0x26   :  { %262 = vmatpush1.bf16.msra.mxu1 %v748_v6  ;;  %v698_v39 = vunpack.c.l.bf16 %v697_v35  ;;  %v699_v46 = vunpack.c.h.bf16 %v697_v35  ;;  %v771_v63 = vld [vmem:[%s981_s5] sm:$0xff]   ;;  %v779_v6 = vld [vmem:[#allocation5 + $0x50] ss:$8 sps:$4 sm:$0xff]   ;;  %s872_s5 = smov [#allocation7]  }
  0x27   :  { %263 = vmatprep.subr.bf16.mxu1 %v753_v7  ;;  %v778_v3 = vld [vmem:[#allocation5 + $0x64] ss:$8 sps:$4 sm:$0xff]   ;;  %v776_v4 = vld [vmem:[#allocation5 + $0x60] ss:$8 sps:$4 sm:$0xff]   ;;  %s638_s6 = sshll.u32 %s872_s5, 4  ;;  %s639_s6 = int_to_ptr.vmem [resolvable:$true] %s638_s6 }
  0x28   :  { %v784_v7 = vld [vmem:[#allocation5 + $0x44] ss:$8 sps:$4 sm:$0xff]   ;;  %s841_s11 = scalar_lea.vmem %s639_s6, 256  ;;  %p846_p11 = scmp.lt.s32.totalorder %s639_s6, %s639_s6 }
  0x29   :  { %p842_p10 = scmp.ne.s32.totalorder %s639_s6, %s841_s11  ;;  %p847_p12 = scmp.lt.s32.totalorder %s841_s11, %s841_s11 }
  0x2a   :  { %264 = vmatpush1.bf16.msra.mxu1 %v751_v8  ;;  %v782_v8 = vld [vmem:[#allocation5 + $0x40] ss:$8 sps:$4 sm:$0xff]  }
  0x2b   :  { %265 = vmatprep.subr.bf16.mxu1 %v756_v9  ;;  %v787_v9 = vld [vmem:[#allocation5 + $0x34] ss:$8 sps:$4 sm:$0xff]   ;;  %p848_p13 = por %p847_p12, %p846_p11 }
  0x2d   :  { %p849_p0 = pnand %p848_p13, %p842_p10 }
  0x2e   :  { %266 = vmatpush1.bf16.msra.mxu1 %v754_v10  ;;  %v785_v10 = vld [vmem:[#allocation5 + $0x30] ss:$8 sps:$4 sm:$0xff]  }
  0x2f   :  { %267 = vmatprep.subr.bf16.mxu1 %v759_v11  ;;  %v790_v11 = vld [vmem:[#allocation5 + $0x24] ss:$8 sps:$4 sm:$0xff]  }
  0x32   :  { %268 = vmatpush1.bf16.msra.mxu1 %v757_v12  ;;  %v788_v12 = vld [vmem:[#allocation5 + $0x20] ss:$8 sps:$4 sm:$0xff]  }
  0x33   :  { %269 = vmatprep.subr.bf16.mxu1 %v762_v13  ;;  %v793_v13 = vld [vmem:[#allocation5 + $0x14] ss:$8 sps:$4 sm:$0xff]  }
  0x36   :  { %270 = vmatpush1.bf16.msra.mxu1 %v760_v14  ;;  %v791_v14 = vld [vmem:[#allocation5 + $0x10] ss:$8 sps:$4 sm:$0xff]  }
  0x37   :  { %271 = vmatprep.subr.bf16.mxu1 %v765_v15  ;;  %v796_v15 = vld [vmem:[#allocation5 + $0x4] ss:$8 sps:$4 sm:$0xff]  }
  0x3a   :  { %272 = vmatpush1.bf16.msra.mxu1 %v763_v16  ;;  %v794_v16 = vld [vmem:[#allocation5] ss:$8 sps:$4 sm:$0xff]  }
  0x3b   :  { %273 = vmatprep.subr.bf16.mxu1 %v768_v17 }
  0x3e   :  { %274 = vmatpush1.bf16.msra.mxu1 %v766_v18 }
  0xe1   :  { %v722_v20 = vpop.f32.mrf.mxu1 }
  0xe3   :  { %v162_v21 = vpop.f32.mrf.mxu1 }
  0xe5   :  { %v723_v22 = vpop.f32.mrf.mxu1 }
  0xe6   :  { %v178_v25 = vpack.c.bf16 %v723_v22, %v722_v20 }
  0xe7   :  { %v165_v23 = vpop.f32.mrf.mxu1 }
  0xe8   :  { %v177_v24 = vpack.c.bf16 %v165_v23, %v162_v21 }
  0xea   :  { %292 = vmatmul.mubr.bf16.vlgmr.msra.gmra.mxu1 %v177_v24 }
  0xeb   :  { %301 = vmatprep.mubr.bf16.mxu1 %v871_v19 }
  0xf2   :  { %302 = vmatmul.mubr.bf16.gmra.mxu1 %v178_v25 }
 0x1aa   :  { %v293_v27 = vpop.f32.mrf.mxu1 }
 0x1ac   :  { %v295_v28 = vpop.f32.mrf.mxu1 }
 0x1ae   :  { %v297_v29 = vpop.f32.mrf.mxu1 }
 0x1b0   :  { %v299_v31 = vpop.f32.mrf.mxu1 }
 0x1b2   :  { %v303_v34 = vpop.f32.mrf.mxu1 }
 0x1b3   :  { %v314_v36 = vadd.f32 %v303_v34, %v295_v28 }
 0x1b4   :  { %v305_v38 = vpop.f32.mrf.mxu1 }
 0x1b5   :  { %v334_v40 = vsub.f32 %v706_v33, %v314_v36  ;;  %v312_v41 = vsub.f32 %v293_v27, %v305_v38 }
 0x1b6   :  { %v307_v43 = vpop.f32.mrf.mxu1 }
 0x1b7   :  { %v324_v44 = vsub.f32 %v702_v37, %v312_v41  ;;  %v315_v45 = vadd.f32 %v307_v43, %v299_v31  ;;  %v336_v49 = vmul.f32 %v698_v39, %v334_v40 }
 0x1b8   :  { %v309_v48 = vpop.f32.mrf.mxu1 }
 0x1b9   :  { %v335_v50 = vsub.f32 %v707_v42, %v315_v45  ;;  %v313_v51 = vsub.f32 %v297_v29, %v309_v48  ;;  %v326_v52 = vmul.f32 %v698_v39, %v324_v44  ;;  %v338_v55 = vadd.f32 %v336_v49, %v314_v36 }
 0x1bb   :  { %v337_v53 = vmul.f32 %v699_v46, %v335_v50  ;;  %v325_v54 = vsub.f32 %v703_v47, %v313_v51  ;;  %v328_v58 = vadd.f32 %v326_v52, %v312_v41 }
 0x1bd   :  { %v339_v56 = vadd.f32 %v337_v53, %v315_v45  ;;  %v327_v57 = vmul.f32 %v699_v46, %v325_v54 }
 0x1bf   :  { %v329_v59 = vadd.f32 %v327_v57, %v313_v51  ;;  %v341_v60 = vpack.c.bf16 %v339_v56, %v338_v55 }
 0x1c1   :  { %724 = vmatprep.subr.bf16.mxu0 %v341_v60  ;;  %v340_v61 = vpack.c.bf16 %v329_v59, %v328_v58 }
 0x1c2   :  { %725 = vmatpush3.bf16.msra.mxu0 %v341_v60 }
 0x1c3   :  { %730 = vmatprep.subr.bf16.mxu0 %v340_v61 }
 0x1c5   :  { %727 = vmatmul.mubr.msk.bf16.vlgmr.msra.gmra.mxu0 %vm121_vm0, %v770_v62 }
 0x1c6   :  { %731 = vmatpush3.bf16.msra.mxu0 %v340_v61  ;;  %732 = vmatprep.mubr.msk.bf16.mxu0 %vm121_vm0, %v771_v63 }
 0x1c7   :  { %554 = vmatprep.subr.bf16.mxu0 %v775_v0 }
 0x1cd   :  { %733 = vmatmul.mubr.msk.bf16.vlgmr.msra.gmra.mxu0 %vm121_vm0, %v772_v1 }
 0x1ce   :  { %555 = vmatpush1.bf16.msra.mxu0 %v773_v2  ;;  %586 = vmatprep.mubr.bf16.mxu0 %v871_v19 }
 0x1cf   :  { %556 = vmatprep.subr.bf16.mxu0 %v778_v3 }
 0x1d2   :  { %557 = vmatpush1.bf16.msra.mxu0 %v776_v4 }
 0x1d3   :  { %558 = vmatprep.subr.bf16.mxu0 %v781_v5 }
 0x1d6   :  { %559 = vmatpush1.bf16.msra.mxu0 %v779_v6 }
 0x1d7   :  { %560 = vmatprep.subr.bf16.mxu0 %v784_v7 }
 0x1da   :  { %561 = vmatpush1.bf16.msra.mxu0 %v782_v8 }
 0x1db   :  { %562 = vmatprep.subr.bf16.mxu0 %v787_v9 }
 0x1de   :  { %563 = vmatpush1.bf16.msra.mxu0 %v785_v10 }
 0x1df   :  { %564 = vmatprep.subr.bf16.mxu0 %v790_v11 }
 0x1e2   :  { %565 = vmatpush1.bf16.msra.mxu0 %v788_v12 }
 0x1e3   :  { %566 = vmatprep.subr.bf16.mxu0 %v793_v13 }
 0x1e6   :  { %567 = vmatpush1.bf16.msra.mxu0 %v791_v14 }
 0x1e7   :  { %568 = vmatprep.subr.bf16.mxu0 %v796_v15 }
 0x1ea   :  { %569 = vmatpush1.bf16.msra.mxu0 %v794_v16 }
 0x285   :  { %v728_v17 = vpop.f32.mrf.mxu0 }
 0x287   :  { %v392_v18 = vpop.f32.mrf.mxu0 }
 0x289   :  { %v729_v20 = vpop.f32.mrf.mxu0 }
 0x28b   :  { %v395_v21 = vpop.f32.mrf.mxu0 }
 0x28d   :  { %v734_v22 = vpop.f32.mrf.mxu0 }
 0x28e   :  { %v466_v30 = vadd.f32 %v734_v22, %v728_v17 }
 0x28f   :  { %v457_v23 = vpop.f32.mrf.mxu0 }
 0x290   :  { %v458_v26 = vadd.f32 %v457_v23, %v392_v18 }
 0x291   :  { %v735_v24 = vpop.f32.mrf.mxu0 }
 0x292   :  { %v469_v29 = vadd.f32 %v735_v24, %v729_v20 }
 0x293   :  { %v460_v25 = vpop.f32.mrf.mxu0 }
 0x294   :  { %v461_v27 = vadd.f32 %v460_v25, %v395_v21  ;;  %v473_v31 = vpack.c.bf16 %v469_v29, %v466_v30 }
 0x296   :  { %v472_v28 = vpack.c.bf16 %v461_v27, %v458_v26 }
 0x298   :  { %587 = vmatmul.mubr.bf16.vlgmr.msra.gmra.mxu0 %v472_v28 }
 0x299   :  { %596 = vmatprep.mubr.bf16.mxu0 %v871_v19 }
 0x2a0   :  { %597 = vmatmul.mubr.bf16.gmra.mxu0 %v473_v31 }
 0x358   :  { %v588_v32 = vpop.f32.mrf.mxu0 }
 0x35a   :  { %v590_v33 = vpop.f32.mrf.mxu0 }
 0x35c   :  { %v592_v34 = vpop.f32.mrf.mxu0 }
 0x35e   :  { %v594_v35 = vpop.f32.mrf.mxu0 }
 0x360   :  { %v598_v36 = vpop.f32.mrf.mxu0 }
 0x361   :  { %v609_v37 = vadd.f32 %v598_v36, %v590_v33 }
 0x362   :  { %v600_v38 = vpop.f32.mrf.mxu0 }
 0x363   :  { %v607_v39 = vsub.f32 %v588_v32, %v600_v38  ;;  %v613_v41 = vmul.f32 %v609_v37, %v609_v37 }
 0x364   :  { %v602_v40 = vpop.f32.mrf.mxu0 }
 0x365   :  { %v611_v42 = vmul.f32 %v607_v39, %v607_v39  ;;  %v610_v43 = vadd.f32 %v602_v40, %v594_v35 }
 0x366   :  { %v604_v44 = vpop.f32.mrf.mxu0 }
 0x367   :  { %v615_v45 = vadd.f32 %v613_v41, %v611_v42  ;;  %v608_v46 = vsub.f32 %v592_v34, %v604_v44  ;;  %v614_v19 = vmul.f32 %v610_v43, %v610_v43 }
 0x369   :  { %797 = vrsqrt.f32 %v615_v45  ;;  %v612_v47 = vmul.f32 %v608_v46, %v608_v46  ;;  %vm619_vm1 = vcmp.eq.f32.partialorder %v615_v45, inf  ;;  %v622_v51 = vand.u32 2147483648, %v615_v45 }
 0x36a   :  { %vm621_vm2 = vcmp.eq.f32.partialorder %v615_v45, 0.0 }
 0x36b   :  { %v616_v48 = vadd.f32 %v614_v19, %v612_v47 }
 0x36d   :  { %799 = vrsqrt.f32 %v616_v48  ;;  %vm626_vm3 = vcmp.eq.f32.partialorder %v616_v48, inf  ;;  %v629_v56 = vand.u32 2147483648, %v616_v48  ;;  %vm628_vm4 = vcmp.eq.f32.partialorder %v616_v48, 0.0 }
 0x376   :  { %v798_v49 = vpop.eup %797 }
 0x377   :  { %v618_v50 = vmul.f32 %v798_v49, %v615_v45 }
 0x379   :  { %v620_v52 = vsel %vm619_vm1, %v615_v45, %v618_v50 }
 0x37a   :  { %v800_v53 = vpop.eup %799  ;;  %v623_v54 = vsel %vm621_vm2, %v622_v51, %v620_v52 }
 0x37b   :  { %v625_v55 = vmul.f32 %v800_v53, %v616_v48  ;;  %631 = vst [vmem:[#allocation7] sm:$0xff] %v623_v54 }
 0x37d   :  { %v627_v57 = vsel %vm626_vm3, %v616_v48, %v625_v55 }
 0x37e   :  { %v630_v58 = vsel %vm628_vm4, %v629_v56, %v627_v57 }
 0x37f   :  { %632 = vst [vmem:[#allocation7 + $0x8] sm:$0xff] %v630_v58 }
 0x380   :  { %852 = shalt.err (!%p849_p0)
}
 0x381   :  { %644 = dma.vmem_to_hbm [thread:$0]  %s639_s6, 256, %s984_s8, [#allocation4], %s868_s30, %s868_s30, %s869_s9  }
 0x382   :  { %865 = dma.done.wait [#allocation4], 256  }
 0x383   :  { %866 = vsyncadd [#allocation4], 4294967040 }
 0x384   :  { %648 = vsyncpa [#allocation3], 1 }
 0x385   :  { %649 = vsyncpa [#allocation6], 1 }
 0x386   :  { %650 = vsyncpa [#allocation4], 1 }

</bundles_post_ra>
